<compile_context>
chip_gen: v5e
topology: v5e:2x2
jax: 0.10.0
libtpu: 0.0.40
codegen_flags: <defaults>
</compile_context>

<pallas_src>
import functools
import math

import jax
import jax.numpy as jnp
from jax.experimental import pallas as pl
from jax.experimental.pallas import tpu as pltpu

LN_EPS = 1e-5  # torch.nn.LayerNorm default

# Row indices inside the packed bias/gamma/beta slab.
R_BTP, R_BIP, R_BVO, R_BTO, R_BIO, R_GT, R_BT, R_GI, R_BI = range(9)
N_VEC_ROWS = 16  # padded to a multiple of 8 sublanes


def _round_up(x, m):
    return (x + m - 1) // m * m


def _layer_norm_ref(x, gamma, beta):
    mu = jnp.mean(x, axis=-1, keepdims=True)
    xc = x - mu
    var = jnp.mean(xc * xc, axis=-1, keepdims=True)
    return xc * jax.lax.rsqrt(var + LN_EPS) * gamma + beta


def _layer_norm_padded(x, gamma, beta, n_true):
    # Padded lanes of x are exactly 0 and gamma/beta padded lanes are 0, so we
    # reduce over the full (lane-padded) block but divide by the true feature
    # count: mu = sum/n, var = E[x^2] - mu^2 (biased, matching torch).
    inv_n = 1.0 / n_true
    mu = jnp.sum(x, axis=-1, keepdims=True) * inv_n
    var = jnp.sum(x * x, axis=-1, keepdims=True) * inv_n - mu * mu
    inv = jax.lax.rsqrt(var + LN_EPS)
    return (x - mu) * inv * gamma + beta  # padded lanes -> (0-mu)*inv*0 + 0 = 0


def cross_modal_kernel(text_ref, image_ref,
                       wtp_ref, wip_ref, wvo_ref, wto_ref, wio_ref,
                       vec_ref, out_ref, *, t_true, i_true, hp, tp, ip):
    text = text_ref[...]          # [bb, Tp] f32 (padded lanes are 0)
    image = image_ref[...]        # [bb, Ip] f32
    bb = text.shape[0]

    def vec(row, n):              # (1, n) slice of the packed vector slab (f32)
        return vec_ref[row:row + 1, :n]

    def mm(x, w_ref, bias):
        w = w_ref[...]            # already bf16 (or f32) from the wrapper
        return jnp.dot(x.astype(w.dtype), w,
                       preferred_element_type=jnp.float32) + bias

    # Projections into the (lane-padded) hidden space.
    text_p = mm(text, wtp_ref, vec(R_BTP, hp))     # [bb, Hp]
    img_p = mm(image, wip_ref, vec(R_BIP, hp))     # [bb, Hp]

    # seq_len==1 attention == out_proj(value_proj(kv)); Wv@Wo is pre-folded to
    # Wvo, and both directions share it, so stack the kv activations on the
    # sublane axis and run ONE matmul with 2x MXU row occupancy.
    kv = jnp.concatenate([img_p, text_p], axis=0)  # [2*bb, Hp]
    att = mm(kv, wvo_ref, vec(R_BVO, hp))          # [2*bb, Hp]
    text_att = att[:bb]       # query = text_p, kv = img_p
    image_att = att[bb:]      # query = img_p,  kv = text_p

    # dropout(p=0.1) is identity in eval mode.
    text_out = mm(text_att, wto_ref, vec(R_BTO, tp))     # [bb, Tp]
    image_out = mm(image_att, wio_ref, vec(R_BIO, ip))   # [bb, Ip]

    text_fused = _layer_norm_padded(text + text_out,
                                    vec(R_GT, tp), vec(R_BT, tp), t_true)
    image_fused = _layer_norm_padded(image + image_out,
                                     vec(R_GI, ip), vec(R_BI, ip), i_true)

    # Both halves start at 128-lane boundaries -> pure unmasked stores.
    out_ref[...] = jnp.concatenate([text_fused, image_fused], axis=-1)


@functools.partial(jax.jit, static_argnames=("block_b", "mxu_dtype"))
def cross_modal_attention(text, image, params, *, block_b=None,
                          mxu_dtype="bfloat16"):
    B, T = text.shape
    _, I = image.shape
    H = params["wtp"].shape[1]

    Tp, Ip, Hp = (_round_up(d, 128) for d in (T, I, H))
    Wmax = max(Tp, Ip, Hp)
    out_w = Tp + Ip

    if block_b is None:
        # Single step for small B; for large B split into sublane-aligned
        # parallel steps (>=2 steps lets v7x shard across both TensorCores).
        block_b = B if B <= 128 else math.gcd(B, 128)
    assert B % block_b == 0
    n_steps = B // block_b

    w_dtype = jnp.dtype(mxu_dtype) if mxu_dtype is not None else jnp.float32

    def pad_mat(w, r, c):
        # Zero padding is exact: padded rows/cols contribute nothing downstream.
        return jnp.pad(w, ((0, r - w.shape[0]), (0, c - w.shape[1]))).astype(w_dtype)

    def pad_vec(v):
        v = v.reshape(1, -1)
        return jnp.pad(v, ((0, 0), (0, Wmax - v.shape[1])))

    # Algebraic fold of the shared attention chain (no nonlinearity between
    # value_proj and out_proj): one Hp x Hp matmul instead of two.
    wvo_f32 = params["wv"] @ params["wo"]
    bvo = params["bv"] @ params["wo"] + params["bo"]

    wtp = pad_mat(params["wtp"], Tp, Hp)
    wip = pad_mat(params["wip"], Ip, Hp)
    wvo = pad_mat(wvo_f32, Hp, Hp)
    wto = pad_mat(params["wto"], Hp, Tp)
    wio = pad_mat(params["wio"], Hp, Ip)
    weights = [wtp, wip, wvo, wto, wio]

    # All (1, X) bias/gamma/beta vectors packed into a single f32 slab.
    vec_rows = [params["btp"], params["bip"], bvo, params["bto"], params["bio"],
                params["gt"], params["bt"], params["gi"], params["bi"]]
    vec_slab = jnp.concatenate(
        [pad_vec(v) for v in vec_rows]
        + [jnp.zeros((N_VEC_ROWS - len(vec_rows), Wmax), jnp.float32)], axis=0)

    # Lane-pad the activations so every in-kernel load/store is unmasked.
    text_pad = jnp.pad(text, ((0, 0), (0, Tp - T)))
    image_pad = jnp.pad(image, ((0, 0), (0, Ip - I)))

    def wspec(shape):
        # Constant index_map across the grid -> single pipeline buffer.
        return pl.BlockSpec(shape, lambda i: (0, 0), pipeline_mode=pl.Buffered(1))

    row_t = pl.BlockSpec((block_b, Tp), lambda i: (i, 0))
    row_i = pl.BlockSpec((block_b, Ip), lambda i: (i, 0))
    row_o = pl.BlockSpec((block_b, out_w), lambda i: (i, 0))
    w_specs = [wspec(tuple(w.shape)) for w in weights] + [wspec(tuple(vec_slab.shape))]

    itemsize = jnp.dtype(w_dtype).itemsize
    flops = 4 * B * Hp * (Tp + Ip) + 4 * B * Hp * Hp
    bytes_accessed = (4 * (int(text_pad.size) + int(image_pad.size) + B * out_w)
                      + itemsize * sum(int(w.size) for w in weights)
                      + 4 * int(vec_slab.size))
    cost = pl.CostEstimate(flops=int(flops), transcendentals=2 * B,
                           bytes_accessed=int(bytes_accessed))

    # Explicit VMEM budget: single-buffered weights + double-buffered I/O +
    # rough intermediates, with 4x headroom, capped at v7x's 64 MiB physical.
    weight_bytes = itemsize * sum(int(w.size) for w in weights) + 4 * int(vec_slab.size)
    act_bytes = 4 * block_b * (2 * (Tp + Ip) + 2 * out_w + 8 * Hp)
    vmem_limit = int(min(64 << 20, max(32 << 20, 4 * (weight_bytes + act_bytes))))

    kernel = functools.partial(cross_modal_kernel,
                               t_true=T, i_true=I, hp=Hp, tp=Tp, ip=Ip)

    packed = pl.pallas_call(
        kernel,
        out_shape=jax.ShapeDtypeStruct((B, out_w), jnp.float32),
        grid_spec=pltpu.PrefetchScalarGridSpec(
            num_scalar_prefetch=0,
            grid=(n_steps,),
            in_specs=[row_t, row_i] + w_specs,
            out_specs=row_o,
        ),
        compiler_params=pltpu.CompilerParams(
            dimension_semantics=("parallel",),   # megacore split when n_steps > 1
            vmem_limit_bytes=vmem_limit,
        ),
        cost_estimate=cost,
    )(text_pad, image_pad, *weights, vec_slab)

    return packed[:, :T], packed[:, Tp:Tp + I]


def init_params(key, text_dim, image_dim, hidden_dim):
    ks = jax.random.split(key, 16)
    s = 0.05
    return {
        "wtp": jax.random.normal(ks[0], (text_dim, hidden_dim), jnp.float32) * s,
        "btp": jax.random.normal(ks[1], (hidden_dim,), jnp.float32) * s,
        "wip": jax.random.normal(ks[2], (image_dim, hidden_dim), jnp.float32) * s,
        "bip": jax.random.normal(ks[3], (hidden_dim,), jnp.float32) * s,
        "wv": jax.random.normal(ks[4], (hidden_dim, hidden_dim), jnp.float32) * s,
        "bv": jax.random.normal(ks[5], (hidden_dim,), jnp.float32) * s,
        "wo": jax.random.normal(ks[6], (hidden_dim, hidden_dim), jnp.float32) * s,
        "bo": jax.random.normal(ks[7], (hidden_dim,), jnp.float32) * s,
        "wto": jax.random.normal(ks[8], (hidden_dim, text_dim), jnp.float32) * s,
        "bto": jax.random.normal(ks[9], (text_dim,), jnp.float32) * s,
        "wio": jax.random.normal(ks[10], (hidden_dim, image_dim), jnp.float32) * s,
        "bio": jax.random.normal(ks[11], (image_dim,), jnp.float32) * s,
        "gt": jnp.ones((text_dim,), jnp.float32),
        "bt": jnp.zeros((text_dim,), jnp.float32),
        "gi": jnp.ones((image_dim,), jnp.float32),
        "bi": jnp.zeros((image_dim,), jnp.float32),
    }


def reference(text, image, p):
    text_p = text @ p["wtp"] + p["btp"]
    img_p = image @ p["wip"] + p["bip"]
    text_att = (img_p @ p["wv"] + p["bv"]) @ p["wo"] + p["bo"]
    image_att = (text_p @ p["wv"] + p["bv"]) @ p["wo"] + p["bo"]
    text_out = text_att @ p["wto"] + p["bto"]
    image_out = image_att @ p["wio"] + p["bio"]
    tf = _layer_norm_ref(text + text_out, p["gt"], p["bt"])
    imf = _layer_norm_ref(image + image_out, p["gi"], p["bi"])
    return tf, imf


if __name__ == "__main__":
    key = jax.random.PRNGKey(0)
    k_text, k_image, k_params = jax.random.split(key, 3)

    batch, text_dim, image_dim, hidden_dim = 16, 64, 48, 32
    text = jax.random.normal(k_text, (batch, text_dim), jnp.float32)
    image = jax.random.normal(k_image, (batch, image_dim), jnp.float32)
    params = init_params(k_params, text_dim, image_dim, hidden_dim)

    ref_t, ref_i = reference(text, image, params)

    # Default path: bf16 MXU operands (f32 accumulate, f32 residual/LayerNorm).
    tf_bf, if_bf = cross_modal_attention(text, image, params)
    jax.block_until_ready((tf_bf, if_bf))
    assert jnp.allclose(tf_bf, ref_t, atol=3e-2, rtol=3e-2)
    assert jnp.allclose(if_bf, ref_i, atol=3e-2, rtol=3e-2)

    # f32-operand validation path (bit-close to the torch reference).
    tf, imf = cross_modal_attention(text, image, params, mxu_dtype=None)
    jax.block_until_ready((tf, imf))
    assert jnp.allclose(tf, ref_t, atol=1e-3, rtol=1e-3)
    assert jnp.allclose(imf, ref_i, atol=1e-3, rtol=1e-3)

    print("KERNEL_OK")
</pallas_src>

<mosaic_0001>
module attributes {stable_mosaic.version = 11 : i64} {
  func.func @cross_modal_kernel(%arg0: i32, %arg1: memref<16x128xf32, #tpu.memory_space<vmem>>, %arg2: memref<16x128xf32, #tpu.memory_space<vmem>>, %arg3: memref<128x128xbf16, #tpu.memory_space<vmem>>, %arg4: memref<128x128xbf16, #tpu.memory_space<vmem>>, %arg5: memref<128x128xbf16, #tpu.memory_space<vmem>>, %arg6: memref<128x128xbf16, #tpu.memory_space<vmem>>, %arg7: memref<128x128xbf16, #tpu.memory_space<vmem>>, %arg8: memref<16x128xf32, #tpu.memory_space<vmem>>, %arg9: memref<16x256xf32, #tpu.memory_space<vmem>>) attributes {dimension_semantics = [#tpu.dimension_semantics<parallel>], iteration_bounds = array<i64: 1>, scalar_prefetch = 0 : i64, scratch_operands = 0 : i64, tpu.core_type = #tpu.core_type<tc>, window_params = [{transform_indices = @transform_0, window_bounds = array<i64: 16, 128>}, {transform_indices = @transform_1, window_bounds = array<i64: 16, 128>}, {pipeline_mode = #tpu.pipeline_mode<synchronous>, transform_indices = @transform_2, window_bounds = array<i64: 128, 128>}, {pipeline_mode = #tpu.pipeline_mode<synchronous>, transform_indices = @transform_3, window_bounds = array<i64: 128, 128>}, {pipeline_mode = #tpu.pipeline_mode<synchronous>, transform_indices = @transform_4, window_bounds = array<i64: 128, 128>}, {pipeline_mode = #tpu.pipeline_mode<synchronous>, transform_indices = @transform_5, window_bounds = array<i64: 128, 128>}, {pipeline_mode = #tpu.pipeline_mode<synchronous>, transform_indices = @transform_6, window_bounds = array<i64: 128, 128>}, {pipeline_mode = #tpu.pipeline_mode<synchronous>, transform_indices = @transform_7, window_bounds = array<i64: 16, 128>}, {transform_indices = @transform_8, window_bounds = array<i64: 16, 256>}]} {
    %c0 = arith.constant 0 : index
    %c0_0 = arith.constant 0 : index
    %0 = vector.load %arg1[%c0, %c0_0] : memref<16x128xf32, #tpu.memory_space<vmem>>, vector<16x128xf32>
    %c0_1 = arith.constant 0 : index
    %c0_2 = arith.constant 0 : index
    %1 = vector.load %arg2[%c0_1, %c0_2] : memref<16x128xf32, #tpu.memory_space<vmem>>, vector<16x128xf32>
    %c0_3 = arith.constant 0 : index
    %c0_4 = arith.constant 0 : index
    %2 = vector.load %arg8[%c0_3, %c0_4] : memref<16x128xf32, #tpu.memory_space<vmem>>, vector<1x128xf32>
    %c0_5 = arith.constant 0 : index
    %c0_6 = arith.constant 0 : index
    %3 = vector.load %arg3[%c0_5, %c0_6] : memref<128x128xbf16, #tpu.memory_space<vmem>>, vector<128x128xbf16>
    %4 = arith.truncf %0 : vector<16x128xf32> to vector<16x128xbf16>
    %cst = arith.constant dense<0.000000e+00> : vector<16x128xf32>
    %5 = tpu.matmul %4, %3, %cst {dimension_numbers = #tpu.dot_dimension_numbers<[1], [0], [0], [1], [0, 0, 1, 1], [], []>} : vector<16x128xbf16>, vector<128x128xbf16>, vector<16x128xf32> -> vector<16x128xf32>
    %6 = vector.broadcast %2 : vector<1x128xf32> to vector<16x128xf32>
    %7 = arith.addf %5, %6 : vector<16x128xf32>
    %c1 = arith.constant 1 : index
    %c0_7 = arith.constant 0 : index
    %8 = vector.load %arg8[%c1, %c0_7] : memref<16x128xf32, #tpu.memory_space<vmem>>, vector<1x128xf32>
    %c0_8 = arith.constant 0 : index
    %c0_9 = arith.constant 0 : index
    %9 = vector.load %arg4[%c0_8, %c0_9] : memref<128x128xbf16, #tpu.memory_space<vmem>>, vector<128x128xbf16>
    %10 = arith.truncf %1 : vector<16x128xf32> to vector<16x128xbf16>
    %cst_10 = arith.constant dense<0.000000e+00> : vector<16x128xf32>
    %11 = tpu.matmul %10, %9, %cst_10 {dimension_numbers = #tpu.dot_dimension_numbers<[1], [0], [0], [1], [0, 0, 1, 1], [], []>} : vector<16x128xbf16>, vector<128x128xbf16>, vector<16x128xf32> -> vector<16x128xf32>
    %12 = vector.broadcast %8 : vector<1x128xf32> to vector<16x128xf32>
    %13 = arith.addf %11, %12 : vector<16x128xf32>
    %14 = tpu.concatenate %13, %7 in 0 : vector<16x128xf32>, vector<16x128xf32> -> vector<32x128xf32>
    %c2 = arith.constant 2 : index
    %c0_11 = arith.constant 0 : index
    %15 = vector.load %arg8[%c2, %c0_11] : memref<16x128xf32, #tpu.memory_space<vmem>>, vector<1x128xf32>
    %c0_12 = arith.constant 0 : index
    %c0_13 = arith.constant 0 : index
    %16 = vector.load %arg5[%c0_12, %c0_13] : memref<128x128xbf16, #tpu.memory_space<vmem>>, vector<128x128xbf16>
    %17 = arith.truncf %14 : vector<32x128xf32> to vector<32x128xbf16>
    %cst_14 = arith.constant dense<0.000000e+00> : vector<32x128xf32>
    %18 = tpu.matmul %17, %16, %cst_14 {dimension_numbers = #tpu.dot_dimension_numbers<[1], [0], [0], [1], [0, 0, 1, 1], [], []>} : vector<32x128xbf16>, vector<128x128xbf16>, vector<32x128xf32> -> vector<32x128xf32>
    %19 = vector.broadcast %15 : vector<1x128xf32> to vector<32x128xf32>
    %20 = arith.addf %18, %19 : vector<32x128xf32>
    %21 = vector.extract_strided_slice %20 {offsets = [0, 0], sizes = [16, 128], strides = [1, 1]} : vector<32x128xf32> to vector<16x128xf32>
    %22 = vector.extract_strided_slice %20 {offsets = [16, 0], sizes = [16, 128], strides = [1, 1]} : vector<32x128xf32> to vector<16x128xf32>
    %c3 = arith.constant 3 : index
    %c0_15 = arith.constant 0 : index
    %23 = vector.load %arg8[%c3, %c0_15] : memref<16x128xf32, #tpu.memory_space<vmem>>, vector<1x128xf32>
    %c0_16 = arith.constant 0 : index
    %c0_17 = arith.constant 0 : index
    %24 = vector.load %arg6[%c0_16, %c0_17] : memref<128x128xbf16, #tpu.memory_space<vmem>>, vector<128x128xbf16>
    %25 = arith.truncf %21 : vector<16x128xf32> to vector<16x128xbf16>
    %cst_18 = arith.constant dense<0.000000e+00> : vector<16x128xf32>
    %26 = tpu.matmul %25, %24, %cst_18 {dimension_numbers = #tpu.dot_dimension_numbers<[1], [0], [0], [1], [0, 0, 1, 1], [], []>} : vector<16x128xbf16>, vector<128x128xbf16>, vector<16x128xf32> -> vector<16x128xf32>
    %27 = vector.broadcast %23 : vector<1x128xf32> to vector<16x128xf32>
    %28 = arith.addf %26, %27 : vector<16x128xf32>
    %c4 = arith.constant 4 : index
    %c0_19 = arith.constant 0 : index
    %29 = vector.load %arg8[%c4, %c0_19] : memref<16x128xf32, #tpu.memory_space<vmem>>, vector<1x128xf32>
    %c0_20 = arith.constant 0 : index
    %c0_21 = arith.constant 0 : index
    %30 = vector.load %arg7[%c0_20, %c0_21] : memref<128x128xbf16, #tpu.memory_space<vmem>>, vector<128x128xbf16>
    %31 = arith.truncf %22 : vector<16x128xf32> to vector<16x128xbf16>
    %cst_22 = arith.constant dense<0.000000e+00> : vector<16x128xf32>
    %32 = tpu.matmul %31, %30, %cst_22 {dimension_numbers = #tpu.dot_dimension_numbers<[1], [0], [0], [1], [0, 0, 1, 1], [], []>} : vector<16x128xbf16>, vector<128x128xbf16>, vector<16x128xf32> -> vector<16x128xf32>
    %33 = vector.broadcast %29 : vector<1x128xf32> to vector<16x128xf32>
    %34 = arith.addf %32, %33 : vector<16x128xf32>
    %35 = arith.addf %0, %28 : vector<16x128xf32>
    %c5 = arith.constant 5 : index
    %c0_23 = arith.constant 0 : index
    %36 = vector.load %arg8[%c5, %c0_23] : memref<16x128xf32, #tpu.memory_space<vmem>>, vector<1x128xf32>
    %c6 = arith.constant 6 : index
    %c0_24 = arith.constant 0 : index
    %37 = vector.load %arg8[%c6, %c0_24] : memref<16x128xf32, #tpu.memory_space<vmem>>, vector<1x128xf32>
    %cst_25 = arith.constant dense<0.000000e+00> : vector<16xf32>
    %38 = vector.multi_reduction <add>, %35, %cst_25 [1] : vector<16x128xf32> to vector<16xf32>
    %39 = vector.shape_cast %38 : vector<16xf32> to vector<16x1xf32>
    %cst_26 = arith.constant 1.562500e-02 : f32
    %40 = vector.broadcast %cst_26 : f32 to vector<16x1xf32>
    %41 = arith.mulf %39, %40 : vector<16x1xf32>
    %42 = arith.mulf %35, %35 : vector<16x128xf32>
    %cst_27 = arith.constant dense<0.000000e+00> : vector<16xf32>
    %43 = vector.multi_reduction <add>, %42, %cst_27 [1] : vector<16x128xf32> to vector<16xf32>
    %44 = vector.shape_cast %43 : vector<16xf32> to vector<16x1xf32>
    %cst_28 = arith.constant 1.562500e-02 : f32
    %45 = vector.broadcast %cst_28 : f32 to vector<16x1xf32>
    %46 = arith.mulf %44, %45 : vector<16x1xf32>
    %47 = arith.mulf %41, %41 : vector<16x1xf32>
    %48 = arith.subf %46, %47 : vector<16x1xf32>
    %cst_29 = arith.constant 9.99999974E-6 : f32
    %49 = vector.broadcast %cst_29 : f32 to vector<16x1xf32>
    %50 = arith.addf %48, %49 : vector<16x1xf32>
    %51 = math.rsqrt %50 : vector<16x1xf32>
    %52 = vector.broadcast %41 : vector<16x1xf32> to vector<16x128xf32>
    %53 = arith.subf %35, %52 : vector<16x128xf32>
    %54 = vector.broadcast %51 : vector<16x1xf32> to vector<16x128xf32>
    %55 = arith.mulf %53, %54 : vector<16x128xf32>
    %56 = vector.broadcast %36 : vector<1x128xf32> to vector<16x128xf32>
    %57 = arith.mulf %55, %56 : vector<16x128xf32>
    %58 = vector.broadcast %37 : vector<1x128xf32> to vector<16x128xf32>
    %59 = arith.addf %57, %58 : vector<16x128xf32>
    %60 = arith.addf %1, %34 : vector<16x128xf32>
    %c7 = arith.constant 7 : index
    %c0_30 = arith.constant 0 : index
    %61 = vector.load %arg8[%c7, %c0_30] : memref<16x128xf32, #tpu.memory_space<vmem>>, vector<1x128xf32>
    %c8 = arith.constant 8 : index
    %c0_31 = arith.constant 0 : index
    %62 = vector.load %arg8[%c8, %c0_31] : memref<16x128xf32, #tpu.memory_space<vmem>>, vector<1x128xf32>
    %cst_32 = arith.constant dense<0.000000e+00> : vector<16xf32>
    %63 = vector.multi_reduction <add>, %60, %cst_32 [1] : vector<16x128xf32> to vector<16xf32>
    %64 = vector.shape_cast %63 : vector<16xf32> to vector<16x1xf32>
    %cst_33 = arith.constant 0.020833334 : f32
    %65 = vector.broadcast %cst_33 : f32 to vector<16x1xf32>
    %66 = arith.mulf %64, %65 : vector<16x1xf32>
    %67 = arith.mulf %60, %60 : vector<16x128xf32>
    %cst_34 = arith.constant dense<0.000000e+00> : vector<16xf32>
    %68 = vector.multi_reduction <add>, %67, %cst_34 [1] : vector<16x128xf32> to vector<16xf32>
    %69 = vector.shape_cast %68 : vector<16xf32> to vector<16x1xf32>
    %cst_35 = arith.constant 0.020833334 : f32
    %70 = vector.broadcast %cst_35 : f32 to vector<16x1xf32>
    %71 = arith.mulf %69, %70 : vector<16x1xf32>
    %72 = arith.mulf %66, %66 : vector<16x1xf32>
    %73 = arith.subf %71, %72 : vector<16x1xf32>
    %cst_36 = arith.constant 9.99999974E-6 : f32
    %74 = vector.broadcast %cst_36 : f32 to vector<16x1xf32>
    %75 = arith.addf %73, %74 : vector<16x1xf32>
    %76 = math.rsqrt %75 : vector<16x1xf32>
    %77 = vector.broadcast %66 : vector<16x1xf32> to vector<16x128xf32>
    %78 = arith.subf %60, %77 : vector<16x128xf32>
    %79 = vector.broadcast %76 : vector<16x1xf32> to vector<16x128xf32>
    %80 = arith.mulf %78, %79 : vector<16x128xf32>
    %81 = vector.broadcast %61 : vector<1x128xf32> to vector<16x128xf32>
    %82 = arith.mulf %80, %81 : vector<16x128xf32>
    %83 = vector.broadcast %62 : vector<1x128xf32> to vector<16x128xf32>
    %84 = arith.addf %82, %83 : vector<16x128xf32>
    %85 = tpu.concatenate %59, %84 in 1 : vector<16x128xf32>, vector<16x128xf32> -> vector<16x256xf32>
    %c0_37 = arith.constant 0 : index
    %c0_38 = arith.constant 0 : index
    %86 = vector.load %arg9[%c0_37, %c0_38] : memref<16x256xf32, #tpu.memory_space<vmem>>, vector<16x256xf32>
    tpu.vector_store %arg9[%c0_37, %c0_38], %85 {strides = array<i32>} : memref<16x256xf32, #tpu.memory_space<vmem>>, vector<16x256xf32>,
    return
  }
  func.func @transform_0(%arg0: i32) -> (i32, i32) {
    %c0_i32 = arith.constant 0 : i32
    %c0_i32_0 = arith.constant 0 : i32
    return %arg0, %c0_i32 : i32, i32
  }
  func.func @transform_1(%arg0: i32) -> (i32, i32) {
    %c0_i32 = arith.constant 0 : i32
    %c0_i32_0 = arith.constant 0 : i32
    return %arg0, %c0_i32 : i32, i32
  }
  func.func @transform_2(%arg0: i32) -> (i32, i32) {
    %c0_i32 = arith.constant 0 : i32
    %c0_i32_0 = arith.constant 0 : i32
    %c0_i32_1 = arith.constant 0 : i32
    return %c0_i32, %c0_i32_0 : i32, i32
  }
  func.func @transform_3(%arg0: i32) -> (i32, i32) {
    %c0_i32 = arith.constant 0 : i32
    %c0_i32_0 = arith.constant 0 : i32
    %c0_i32_1 = arith.constant 0 : i32
    return %c0_i32, %c0_i32_0 : i32, i32
  }
  func.func @transform_4(%arg0: i32) -> (i32, i32) {
    %c0_i32 = arith.constant 0 : i32
    %c0_i32_0 = arith.constant 0 : i32
    %c0_i32_1 = arith.constant 0 : i32
    return %c0_i32, %c0_i32_0 : i32, i32
  }
  func.func @transform_5(%arg0: i32) -> (i32, i32) {
    %c0_i32 = arith.constant 0 : i32
    %c0_i32_0 = arith.constant 0 : i32
    %c0_i32_1 = arith.constant 0 : i32
    return %c0_i32, %c0_i32_0 : i32, i32
  }
  func.func @transform_6(%arg0: i32) -> (i32, i32) {
    %c0_i32 = arith.constant 0 : i32
    %c0_i32_0 = arith.constant 0 : i32
    %c0_i32_1 = arith.constant 0 : i32
    return %c0_i32, %c0_i32_0 : i32, i32
  }
  func.func @transform_7(%arg0: i32) -> (i32, i32) {
    %c0_i32 = arith.constant 0 : i32
    %c0_i32_0 = arith.constant 0 : i32
    %c0_i32_1 = arith.constant 0 : i32
    return %c0_i32, %c0_i32_0 : i32, i32
  }
  func.func @transform_8(%arg0: i32) -> (i32, i32) {
    %c0_i32 = arith.constant 0 : i32
    %c0_i32_0 = arith.constant 0 : i32
    return %arg0, %c0_i32 : i32, i32
  }
}

</mosaic_0001>

<bundles_post_ra>
// kernel: cross_modal_attention.1
= control target key start
LH: loop header
LB: loop body
LE: loop exit
PB: predicated region body
PF: predicated region fallthrough
CT: control target
= control target key end

     0   :  { %s1038_s3 = inlined_call_operand.vmem [shape: bf16[128,128], index: 3, kind: input, shape index: {}]   ;;  %s1039_s2 = inlined_call_operand.vmem [shape: bf16[128,128], index: 2, kind: input, shape index: {}]   ;;  %s1040_s4 = inlined_call_operand.vmem [shape: bf16[128,128], index: 4, kind: input, shape index: {}]   ;;  %s1041_s7 = inlined_call_operand.vmem [shape: f32[16,128], index: 7, kind: input, shape index: {}]   ;;  %s1042_s1 = inlined_call_operand.vmem [shape: f32[16,128], index: 1, kind: input, shape index: {}]   ;;  %s1043_s0 = inlined_call_operand.vmem [shape: f32[16,128], index: 0, kind: input, shape index: {}]   ;;  %s1044_s5 = inlined_call_operand.vmem [shape: bf16[128,128], index: 5, kind: input, shape index: {}]   ;;  %s1045_s6 = inlined_call_operand.vmem [shape: bf16[128,128], index: 6, kind: input, shape index: {}]   ;;  %s1046_s8 = inlined_call_operand.vmem [shape: f32[16,256], index: 8, kind: output, shape index: {}]  }
   0x1   :  { %v735_v0 = vld [vmem:[%s1038_s3 + $0x38] sm:$0xff]  ;;  %v734_v2 = vld [vmem:[%s1038_s3 + $0x30] sm:$0xff]  ;;  %v733_v4 = vld [vmem:[%s1038_s3 + $0x28] sm:$0xff] }
   0x2   :  { %v727_v1 = vld [vmem:[%s1039_s2 + $0x38] sm:$0xff]  ;;  %181 = vmatpush.bf16.msra.mxu1 %v735_v0  ;;  %v726_v3 = vld [vmem:[%s1039_s2 + $0x30] sm:$0xff]  ;;  %v725_v5 = vld [vmem:[%s1039_s2 + $0x28] sm:$0xff] }
   0x3   :  { %100 = vmatpush.bf16.msra.mxu0 %v727_v1  ;;  %v743_v6 = vld [vmem:[%s1040_s4 + $0x38] sm:$0xff]  ;;  %v732_v7 = vld [vmem:[%s1038_s3 + $0x20] sm:$0xff]  ;;  %v742_v9 = vld [vmem:[%s1040_s4 + $0x30] sm:$0xff] }
   0x4   :  { %v724_v8 = vld [vmem:[%s1039_s2 + $0x20] sm:$0xff]  ;;  %263 = vmatpush.bf16.msra.mxu2 %v743_v6  ;;  %v741_v10 = vld [vmem:[%s1040_s4 + $0x28] sm:$0xff]  ;;  %v731_v11 = vld [vmem:[%s1038_s3 + $0x18] sm:$0xff] }
   0x5   :  { %v723_v12 = vld [vmem:[%s1039_s2 + $0x18] sm:$0xff]  ;;  %v740_v13 = vld [vmem:[%s1040_s4 + $0x20] sm:$0xff]  ;;  %v730_v14 = vld [vmem:[%s1038_s3 + $0x10] sm:$0xff] }
   0x6   :  { %182 = vmatpush.bf16.msra.mxu1 %v734_v2  ;;  %v722_v15 = vld [vmem:[%s1039_s2 + $0x10] sm:$0xff]  ;;  %v739_v16 = vld [vmem:[%s1040_s4 + $0x18] sm:$0xff]  ;;  %v729_v17 = vld [vmem:[%s1038_s3 + $0x8] sm:$0xff] }
   0x7   :  { %101 = vmatpush.bf16.msra.mxu0 %v726_v3  ;;  %v721_v18 = vld [vmem:[%s1039_s2 + $0x8] sm:$0xff]  ;;  %v728_v19 = vld [vmem:[%s1038_s3] sm:$0xff]  ;;  %v738_v27 = vld [vmem:[%s1040_s4 + $0x10] sm:$0xff] }
   0x8   :  { %264 = vmatpush.bf16.msra.mxu2 %v742_v9  ;;  %v885_v20 = vld [vmem:[%s1042_s1] sm:$0xff]  ;;  %v890_v21 = vld [vmem:[%s1042_s1 + $0x8] sm:$0xff]  ;;  %v751_v30 = vld [vmem:[%s1044_s5 + $0x38] sm:$0xff] }
   0x9   :  { %v720_v22 = vld [vmem:[%s1039_s2] sm:$0xff]  ;;  %v903_v24 = vld [vmem:[%s1043_s0 + $0x8] sm:$0xff]  ;;  %v131_v25 = vpack.c.bf16 %v890_v21, %v885_v20  ;;  %v759_v31 = vld [vmem:[%s1045_s6 + $0x38] sm:$0xff]  ;;  %349 = vmatpush.bf16.msra.mxu3 %v751_v30 }
   0xa   :  { %183 = vmatpush.bf16.msra.mxu1 %v733_v4  ;;  %v898_v23 = vld [vmem:[%s1043_s0] sm:$0xff]  ;;  %v737_v28 = vld [vmem:[%s1040_s4 + $0x8] sm:$0xff]  ;;  %v750_v32 = vld [vmem:[%s1044_s5 + $0x30] sm:$0xff] }
   0xb   :  { %102 = vmatpush.bf16.msra.mxu0 %v725_v5  ;;  %v50_v26 = vpack.c.bf16 %v903_v24, %v898_v23  ;;  %v736_v29 = vld [vmem:[%s1040_s4] sm:$0xff]  ;;  %v749_v34 = vld [vmem:[%s1044_s5 + $0x28] sm:$0xff]  ;;  %v747_v42 = vld [vmem:[%s1044_s5 + $0x18] sm:$0xff] }
   0xc   :  { %265 = vmatpush.bf16.msra.mxu2 %v741_v10  ;;  %v760_v35 = vld [vmem:[%s1041_s7 + $0x1] ss:$0 sm:$0xff]  ;;  %v761_v43 = vld [vmem:[%s1041_s7] ss:$0 sm:$0xff]  ;;  %v746_v48 = vld [vmem:[%s1044_s5 + $0x10] sm:$0xff] }
   0xd   :  { %350 = vmatpush.bf16.msra.mxu3 %v750_v32  ;;  %v748_v36 = vld [vmem:[%s1044_s5 + $0x20] sm:$0xff]  ;;  %v758_v49 = vld [vmem:[%s1045_s6 + $0x30] sm:$0xff]  ;;  %v745_v50 = vld [vmem:[%s1044_s5 + $0x8] sm:$0xff] }
   0xe   :  { %184 = vmatpush.bf16.msra.mxu1 %v732_v7  ;;  %v757_v51 = vld [vmem:[%s1045_s6 + $0x28] sm:$0xff]  ;;  %v744_v52 = vld [vmem:[%s1044_s5] sm:$0xff]  ;;  %v755_v54 = vld [vmem:[%s1045_s6 + $0x18] sm:$0xff] }
   0xf   :  { %103 = vmatpush.bf16.msra.mxu0 %v724_v8  ;;  %v756_v53 = vld [vmem:[%s1045_s6 + $0x20] sm:$0xff]  ;;  %v754_v55 = vld [vmem:[%s1045_s6 + $0x10] sm:$0xff]  ;;  %v753_v56 = vld [vmem:[%s1045_s6 + $0x8] sm:$0xff] }
  0x10   :  { %266 = vmatpush.bf16.msra.mxu2 %v740_v13  ;;  %v752_v57 = vld [vmem:[%s1045_s6] sm:$0xff] }
  0x11   :  { %351 = vmatpush.bf16.msra.mxu3 %v749_v34  ;;  %v762_v59 = vld [vmem:[%s1041_s7 + $0x2] ss:$0 sm:$0xff]  ;;  %v763_v5 = vld [vmem:[%s1041_s7 + $0x3] ss:$0 sm:$0xff]  ;;  %v764_v10 = vld [vmem:[%s1041_s7 + $0x4] ss:$0 sm:$0xff] }
  0x12   :  { %185 = vmatpush.bf16.msra.mxu1 %v731_v11 }
  0x13   :  { %104 = vmatpush.bf16.msra.mxu0 %v723_v12 }
  0x14   :  { %267 = vmatpush.bf16.msra.mxu2 %v739_v16 }
  0x15   :  { %352 = vmatpush.bf16.msra.mxu3 %v748_v36 }
  0x16   :  { %186 = vmatpush.bf16.msra.mxu1 %v730_v14 }
  0x17   :  { %105 = vmatpush.bf16.msra.mxu0 %v722_v15 }
  0x18   :  { %268 = vmatpush.bf16.msra.mxu2 %v738_v27 }
  0x19   :  { %353 = vmatpush.bf16.msra.mxu3 %v747_v42 }
  0x1a   :  { %187 = vmatpush.bf16.msra.mxu1 %v729_v17 }
  0x1b   :  { %106 = vmatpush.bf16.msra.mxu0 %v721_v18 }
  0x1c   :  { %269 = vmatpush.bf16.msra.mxu2 %v737_v28 }
  0x1d   :  { %354 = vmatpush.bf16.msra.mxu3 %v746_v48 }
  0x1e   :  { %188 = vmatpush.bf16.msra.mxu1 %v728_v19 }
  0x1f   :  { %107 = vmatpush.bf16.msra.mxu0 %v720_v22 }
  0x20   :  { %270 = vmatpush.bf16.msra.mxu2 %v736_v29 }
  0x21   :  { %189 = vmatmul.bf16.vlgmr.msra.gmra.mxu1 %v131_v25  ;;  %355 = vmatpush.bf16.msra.mxu3 %v745_v50 }
  0x22   :  { %108 = vmatmul.bf16.vlgmr.msra.gmra.mxu0 %v50_v26 }
  0x23   :  { %430 = vmatpush.bf16.msrb.mxu0 %v759_v31 }
  0x25   :  { %356 = vmatpush.bf16.msra.mxu3 %v744_v52 }
  0x27   :  { %431 = vmatpush.bf16.msrb.mxu0 %v758_v49 }
  0x2b   :  { %432 = vmatpush.bf16.msrb.mxu0 %v757_v51 }
  0x2f   :  { %433 = vmatpush.bf16.msrb.mxu0 %v756_v53 }
  0x33   :  { %434 = vmatpush.bf16.msrb.mxu0 %v755_v54 }
  0x37   :  { %435 = vmatpush.bf16.msrb.mxu0 %v754_v55  ;;  %v765_v55 = vld [vmem:[%s1041_s7 + $0x5] ss:$0 sm:$0xff] }
  0x3b   :  { %436 = vmatpush.bf16.msrb.mxu0 %v753_v56 }
  0x3f   :  { %437 = vmatpush.bf16.msrb.mxu0 %v752_v57 }
  0x9e   :  { %v190_v33 = vpop.f32.mrf.mxu1 }
  0x9f   :  { %v191_v38 = vadd.f32 %v760_v35, %v190_v33  ;;  %v109_v40 = vpop.f32.mrf.mxu0 }
  0xa0   :  { %v110_v45 = vadd.f32 %v761_v43, %v109_v40 }
  0xa6   :  { %v192_v37 = vpop.f32.mrf.mxu1 }
  0xa7   :  { %v193_v39 = vadd.f32 %v760_v35, %v192_v37  ;;  %v111_v44 = vpop.f32.mrf.mxu0 }
  0xa8   :  { %v112_v46 = vadd.f32 %v761_v43, %v111_v44 }
  0xa9   :  { %v212_v41 = vpack.c.bf16 %v193_v39, %v191_v38 }
  0xaa   :  { %v213_v47 = vpack.c.bf16 %v112_v46, %v110_v45 }
  0xab   :  { %271 = vmatmul.bf16.vlgmr.msra.gmra.mxu2 %v212_v41 }
  0xbb   :  { %276 = vmatmul.bf16.gmra.mxu2 %v213_v47 }
 0x12e   :  { %v272_v58 = vpop.f32.mrf.mxu2 }
 0x12f   :  { %v273_v61 = vadd.f32 %v762_v59, %v272_v58 }
 0x136   :  { %v274_v60 = vpop.f32.mrf.mxu2 }
 0x137   :  { %v275_v62 = vadd.f32 %v762_v59, %v274_v60 }
 0x139   :  { %v299_v63 = vpack.c.bf16 %v275_v62, %v273_v61 }
 0x13b   :  { %357 = vmatmul.bf16.vlgmr.msra.gmra.mxu3 %v299_v63 }
 0x13e   :  { %v277_v0 = vpop.f32.mrf.mxu2 }
 0x13f   :  { %v278_v2 = vadd.f32 %v762_v59, %v277_v0 }
 0x146   :  { %v279_v1 = vpop.f32.mrf.mxu2 }
 0x147   :  { %v280_v3 = vadd.f32 %v762_v59, %v279_v1  ;;  %v766_v59 = vld [vmem:[%s1041_s7 + $0x6] ss:$0 sm:$0xff] }
 0x149   :  { %v380_v4 = vpack.c.bf16 %v280_v3, %v278_v2 }
 0x14b   :  { %438 = vmatmul.bf16.vlgmr.msrb.gmra.mxu0 %v380_v4 }
 0x1be   :  { %v358_v6 = vpop.f32.mrf.mxu3 }
 0x1bf   :  { %v359_v7 = vadd.f32 %v763_v5, %v358_v6 }
 0x1c1   :  { %v979_v8 = vadd.f32 %v359_v7, %v898_v23 }
 0x1c3   :  { %448 = vadd.xlane.f32.xlu0 %v979_v8  ;;  %v454_v9 = vmul.f32 %v979_v8, %v979_v8 }
 0x1c5   :  { %456 = vadd.xlane.f32.xlu2 %v454_v9 }
 0x1c6   :  { %v360_v11 = vpop.f32.mrf.mxu3 }
 0x1c7   :  { %v361_v12 = vadd.f32 %v763_v5, %v360_v11 }
 0x1c8   :  { %v439_v13 = vpop.f32.mrf.mxu0 }
 0x1c9   :  { %v988_v14 = vadd.f32 %v361_v12, %v903_v24  ;;  %v440_v15 = vadd.f32 %v764_v10, %v439_v13 }
 0x1cb   :  { %v991_v16 = vadd.f32 %v440_v15, %v885_v20  ;;  %450 = vadd.xlane.f32.xlu0 %v988_v14  ;;  %v455_v17 = vmul.f32 %v988_v14, %v988_v14 }
 0x1cd   :  { %458 = vadd.xlane.f32.xlu2 %v455_v17  ;;  %502 = vadd.xlane.f32.xlu1 %v991_v16  ;;  %v508_v22 = vmul.f32 %v991_v16, %v991_v16 }
 0x1d0   :  { %v441_v18 = vpop.f32.mrf.mxu0 }
 0x1d1   :  { %v442_v19 = vadd.f32 %v764_v10, %v441_v18 }
 0x1d3   :  { %v1000_v23 = vadd.f32 %v442_v19, %v890_v21  ;;  %510 = vadd.xlane.f32.xlu0 %v508_v22 }
 0x1d5   :  { %504 = vadd.xlane.f32.xlu1 %v1000_v23  ;;  %v509_v20 = vmul.f32 %v1000_v23, %v1000_v23 }
 0x1dd   :  { %512 = vadd.xlane.f32.xlu1 %v509_v20  ;;  %v767_v20 = vld [vmem:[%s1041_s7 + $0x7] ss:$0 sm:$0xff] }
 0x236   :  { %v449_v24 = vpop.xlane.xlu0 %448 }
 0x237   :  { %v452_v25 = vmul.f32 0.015625, %v449_v24 }
 0x238   :  { %v457_v26 = vpop.xlane.xlu2 %456 }
 0x239   :  { %v462_v27 = vmul.f32 %v452_v25, %v452_v25  ;;  %v460_v28 = vmul.f32 0.015625, %v457_v26  ;;  %v488_v54 = vsub.f32 %v979_v8, %v452_v25  ;;  %v768_v25 = vld [vmem:[%s1041_s7 + $0x8] ss:$0 sm:$0xff] }
 0x23b   :  { %v464_v29 = vsub.f32 %v460_v28, %v462_v27 }
 0x23d   :  { %v466_v30 = vadd.f32 1e-05, %v464_v29 }
 0x23e   :  { %v451_v31 = vpop.xlane.xlu0 %450 }
 0x23f   :  { %769 = vrsqrt.f32 %v466_v30  ;;  %v453_v32 = vmul.f32 0.015625, %v451_v31  ;;  %vm474_vm1 = vweird.f32 %v466_v30 }
 0x240   :  { %v459_v33 = vpop.xlane.xlu2 %458  ;;  %v503_v21 = vpop.xlane.xlu1 %502 }
 0x241   :  { %v463_v34 = vmul.f32 %v453_v32, %v453_v32  ;;  %v461_v35 = vmul.f32 0.015625, %v459_v33  ;;  %v1005_v37 = vmul.f32 0.020833334, %v503_v21  ;;  %v489_v9 = vsub.f32 %v988_v14, %v453_v32 }
 0x243   :  { %v465_v36 = vsub.f32 %v461_v35, %v463_v34  ;;  %v516_v42 = vmul.f32 %v1005_v37, %v1005_v37  ;;  %v542_v22 = vsub.f32 %v991_v16, %v1005_v37 }
 0x245   :  { %v770_v38 = vpop.eup %769  ;;  %v467_v39 = vadd.f32 1e-05, %v465_v36 }
 0x246   :  { %v469_v40 = vmul.f32 %v770_v38, %v466_v30  ;;  %v511_v41 = vpop.xlane.xlu0 %510  ;;  %vm475_vm0 = vweird.f32 %v770_v38 }
 0x247   :  { %771 = vrsqrt.f32 %v467_v39  ;;  %v514_v43 = vmul.f32 0.020833334, %v511_v41  ;;  %vm476_vm2 = vmor %vm474_vm1, %vm475_vm0  ;;  %vm484_vm4 = vweird.f32 %v467_v39 }
 0x248   :  { %v470_v44 = vmul.f32 %v770_v38, %v469_v40  ;;  %v505_v45 = vpop.xlane.xlu1 %504 }
 0x249   :  { %v518_v46 = vsub.f32 %v514_v43, %v516_v42  ;;  %v507_v51 = vmul.f32 0.020833334, %v505_v45 }
 0x24a   :  { %v471_v47 = vmul.f32 0.5, %v470_v44 }
 0x24b   :  { %v520_v48 = vadd.f32 1e-05, %v518_v46  ;;  %v517_v61 = vmul.f32 %v507_v51, %v507_v51  ;;  %v543_v32 = vsub.f32 %v1000_v23, %v507_v51 }
 0x24c   :  { %v472_v49 = vsub.f32 1.5, %v471_v47 }
 0x24d   :  { %v772_v50 = vpop.eup %771  ;;  %773 = vrsqrt.f32 %v520_v48  ;;  %vm528_vm7 = vweird.f32 %v520_v48 }
 0x24e   :  { %v473_v52 = vmul.f32 %v770_v38, %v472_v49  ;;  %v479_v53 = vmul.f32 %v772_v50, %v467_v39  ;;  %vm485_vm3 = vweird.f32 %v772_v50 }
 0x24f   :  { %vm486_vm5 = vmor %vm484_vm4, %vm485_vm3 }
 0x250   :  { %v477_v56 = vsel %vm476_vm2, %v770_v38, %v473_v52  ;;  %v480_v57 = vmul.f32 %v772_v50, %v479_v53  ;;  %v513_v58 = vpop.xlane.xlu1 %512 }
 0x251   :  { %v490_v60 = vmul.f32 %v488_v54, %v477_v56  ;;  %v515_v62 = vmul.f32 0.020833334, %v513_v58 }
 0x252   :  { %v481_v63 = vmul.f32 0.5, %v480_v57 }
 0x253   :  { %v774_v0 = vpop.eup %773  ;;  %v493_v1 = vmul.f32 %v765_v55, %v490_v60  ;;  %v519_v2 = vsub.f32 %v515_v62, %v517_v61 }
 0x254   :  { %v482_v3 = vsub.f32 1.5, %v481_v63  ;;  %v523_v4 = vmul.f32 %v774_v0, %v520_v48  ;;  %vm529_vm6 = vweird.f32 %v774_v0 }
 0x255   :  { %v496_v5 = vadd.f32 %v766_v59, %v493_v1  ;;  %v521_v6 = vadd.f32 1e-05, %v519_v2  ;;  %vm530_vm8 = vmor %vm528_vm7, %vm529_vm6 }
 0x256   :  { %v483_v7 = vmul.f32 %v772_v50, %v482_v3  ;;  %v524_v8 = vmul.f32 %v774_v0, %v523_v4 }
 0x257   :  { %552 = vst [vmem:[%s1046_s8] sm:$0xff] %v496_v5  ;;  %775 = vrsqrt.f32 %v521_v6  ;;  %vm538_vm10 = vweird.f32 %v521_v6 }
 0x258   :  { %v487_v10 = vsel %vm486_vm5, %v772_v50, %v483_v7  ;;  %v525_v11 = vmul.f32 0.5, %v524_v8 }
 0x259   :  { %v491_v12 = vmul.f32 %v489_v9, %v487_v10 }
 0x25a   :  { %v526_v13 = vsub.f32 1.5, %v525_v11 }
 0x25b   :  { %v494_v15 = vmul.f32 %v765_v55, %v491_v12 }
 0x25c   :  { %v527_v17 = vmul.f32 %v774_v0, %v526_v13 }
 0x25d   :  { %v776_v18 = vpop.eup %775  ;;  %v497_v19 = vadd.f32 %v766_v59, %v494_v15 }
 0x25e   :  { %v531_v14 = vsel %vm530_vm8, %v774_v0, %v527_v17  ;;  %v533_v24 = vmul.f32 %v776_v18, %v521_v6  ;;  %vm539_vm9 = vweird.f32 %v776_v18 }
 0x25f   :  { %554 = vst [vmem:[%s1046_s8 + $0x10] sm:$0xff] %v497_v19  ;;  %v544_v26 = vmul.f32 %v542_v22, %v531_v14  ;;  %vm540_vm11 = vmor %vm538_vm10, %vm539_vm9 }
 0x260   :  { %v534_v27 = vmul.f32 %v776_v18, %v533_v24 }
 0x261   :  { %v547_v28 = vmul.f32 %v767_v20, %v544_v26 }
 0x262   :  { %v535_v29 = vmul.f32 0.5, %v534_v27 }
 0x263   :  { %v550_v16 = vadd.f32 %v768_v25, %v547_v28 }
 0x264   :  { %v536_v30 = vsub.f32 1.5, %v535_v29 }
 0x265   :  { %553 = vst [vmem:[%s1046_s8 + $0x8] sm:$0xff] %v550_v16 }
 0x266   :  { %v537_v31 = vmul.f32 %v776_v18, %v536_v30 }
 0x268   :  { %v541_v33 = vsel %vm540_vm11, %v776_v18, %v537_v31 }
 0x269   :  { %v545_v21 = vmul.f32 %v543_v32, %v541_v33 }
 0x26b   :  { %v548_v34 = vmul.f32 %v767_v20, %v545_v21 }
 0x26d   :  { %v551_v35 = vadd.f32 %v768_v25, %v548_v34 }
 0x26f   :  { %555 = vst [vmem:[%s1046_s8 + $0x18] sm:$0xff] %v551_v35 }

</bundles_post_ra>
